<compile_context>
chip_gen: v5e
topology: v5e:2x2
jax: 0.10.0
libtpu: 0.0.40
codegen_flags: <defaults>
</compile_context>

<pallas_src>
import jax
import jax.numpy as jnp
from jax.experimental import pallas as pl
from jax.experimental.pallas import tpu as pltpu


# Total per-step VMEM budget: 2x double-buffered IO blocks + f32 temporaries.
_TARGET_VMEM_BYTES = 40 * 1024 * 1024
# Explicit scoped-VMEM limit (v5e's default scoped limit is only 16 MiB).
_VMEM_LIMIT_BYTES = 48 * 1024 * 1024
_MAX_TILE_L = 8192


def _round_up(x, m):
    return (x + m - 1) // m * m


def _attention_kernel(data_ref, logits_ref, o_ref):
    # data_ref / logits_ref / o_ref: (tile_b, C//2, tile_l).
    # Softmax over the channel (sublane) axis in f32. Exact division: this
    # kernel is HBM-bound, so the precise reciprocal is hidden under DMA.
    logits = logits_ref[...].astype(jnp.float32)
    m = jnp.max(logits, axis=1, keepdims=True)
    e = jnp.exp(logits - m)
    denom = jnp.sum(e, axis=1, keepdims=True)
    softmax = e / denom
    o_ref[...] = (data_ref[...] * softmax).astype(o_ref.dtype)


def attention_layer(x):
    """x: (B, C, L) with C even -> x[:, :C//2] * softmax(x[:, C//2:], axis=1)."""
    B, C, L = x.shape
    assert C % 2 == 0, "channel dim must be even"
    half = C // 2
    itemsize = jnp.dtype(x.dtype).itemsize
    out_dtype = x.dtype

    # Free, contiguous view: split channels into (data, logits) halves so each
    # kernel block spans the full `half` axis (no sublane-alignment requirement
    # and no in-kernel channel slicing for any C).
    x4 = x.reshape(B, 2, half, L)

    # VMEM cost per (batch row, lane column): both input halves + output,
    # double-buffered by the pipeline, plus ~3 f32 temporaries of the logits
    # block (upcast logits / exp / softmax).
    io_per_lane = C * itemsize + half * itemsize
    tmp_per_lane = 3 * half * 4
    vmem_per_lane = 2 * io_per_lane + tmp_per_lane

    # Lane tile: full L when L <= 128 (allowed: equals the array dim), else a
    # multiple of 128 sized from the VMEM budget. No wrapper-side padding —
    # Pallas masks the ragged final lane tile.
    if L <= 128:
        tile_l = L
    else:
        budget_l = max(128, (_TARGET_VMEM_BYTES // vmem_per_lane) // 128 * 128)
        tile_l = min(_MAX_TILE_L, budget_l, _round_up(L, 128))

    # Batch tile: pack rows up to the budget; ragged leading blocks are fine
    # (the (8,128) constraint only applies to the last two dims).
    bt_cap = max(1, _TARGET_VMEM_BYTES // (vmem_per_lane * tile_l))
    tile_b = min(B, bt_cap)

    grid_b = pl.cdiv(B, tile_b)
    grid_l = pl.cdiv(L, tile_l)

    # Keep both v7x TensorCores busy: avoid a degenerate single-step grid when
    # the problem can be split (one extra ~0.35us step is noise on 1-TC chips).
    if grid_b * grid_l == 1:
        if tile_l > 128:
            tile_l = _round_up(pl.cdiv(tile_l, 2), 128)
            grid_l = pl.cdiv(L, tile_l)
        elif B > 1:
            tile_b = pl.cdiv(B, 2)
            grid_b = pl.cdiv(B, tile_b)

    # TODO(synk): for very large C a single 128-lane tile (plus f32 temps) can
    # exceed v7x's 64 MiB physical VMEM; that case needs channel-axis chunking
    # with an online softmax. Here we only raise the scoped-VMEM limit.
    step_vmem = vmem_per_lane * tile_b * tile_l
    vmem_limit = max(_VMEM_LIMIT_BYTES, min(step_vmem + (8 << 20), 96 << 20))

    grid_spec = pl.GridSpec(
        grid=(grid_b, grid_l),
        in_specs=[
            # Data half: channel-pair index 0 (squeezed out of the kernel ref).
            pl.BlockSpec((tile_b, pl.Squeezed(), half, tile_l),
                         lambda b, l: (b, 0, 0, l)),
            # Logits half: channel-pair index 1 (same HBM array, second view).
            pl.BlockSpec((tile_b, pl.Squeezed(), half, tile_l),
                         lambda b, l: (b, 1, 0, l)),
        ],
        out_specs=pl.BlockSpec((tile_b, half, tile_l), lambda b, l: (b, 0, l)),
    )

    return pl.pallas_call(
        _attention_kernel,
        out_shape=jax.ShapeDtypeStruct((B, half, L), out_dtype),
        grid_spec=grid_spec,
        compiler_params=pltpu.CompilerParams(
            dimension_semantics=("parallel", "parallel"),
            vmem_limit_bytes=vmem_limit,
        ),
    )(x4, x4)


def _reference(x):
    c = x.shape[1]
    data = x[:, : c // 2, :].astype(jnp.float32)
    logits = x[:, c // 2:, :].astype(jnp.float32)
    return (data * jax.nn.softmax(logits, axis=1)).astype(x.dtype)


if __name__ == "__main__":
    # Main case (small shapes consistent with the module's (B, C, L) layout).
    x = jax.random.normal(jax.random.PRNGKey(0), (2, 16, 16), dtype=jnp.float32)
    out = jax.block_until_ready(attention_layer(x))
    ref = _reference(x)
    assert out.shape == (2, 8, 16), out.shape
    assert jnp.allclose(out, ref, atol=1e-5, rtol=1e-5), (
        float(jnp.max(jnp.abs(out - ref)))
    )

    # Odd half-channel count (C//2 = 3): single code path, no alignment needed.
    x2 = jax.random.normal(jax.random.PRNGKey(1), (2, 6, 16), dtype=jnp.float32)
    out2 = jax.block_until_ready(attention_layer(x2))
    ref2 = _reference(x2)
    assert out2.shape == (2, 3, 16), out2.shape
    assert jnp.allclose(out2, ref2, atol=1e-5, rtol=1e-5), (
        float(jnp.max(jnp.abs(out2 - ref2)))
    )

    # L not a multiple of 128: exercises the ragged (masked) edge lane tile
    # with no wrapper-side pad/slice.
    x3 = jax.random.normal(jax.random.PRNGKey(2), (3, 8, 200), dtype=jnp.float32)
    out3 = jax.block_until_ready(attention_layer(x3))
    ref3 = _reference(x3)
    assert out3.shape == (3, 4, 200), out3.shape
    assert jnp.allclose(out3, ref3, atol=1e-5, rtol=1e-5), (
        float(jnp.max(jnp.abs(out3 - ref3)))
    )

    print("KERNEL_OK")
</pallas_src>

<mosaic_0001>
module attributes {stable_mosaic.version = 11 : i64} {
  func.func @_attention_kernel(%arg0: i32, %arg1: i32, %arg2: memref<1x1x8x16xf32, #tpu.memory_space<vmem>>, %arg3: memref<1x1x8x16xf32, #tpu.memory_space<vmem>>, %arg4: memref<1x8x16xf32, #tpu.memory_space<vmem>>) attributes {dimension_semantics = [#tpu.dimension_semantics<parallel>, #tpu.dimension_semantics<parallel>], iteration_bounds = array<i64: 2, 1>, scalar_prefetch = 0 : i64, scratch_operands = 0 : i64, tpu.core_type = #tpu.core_type<tc>, window_params = [{transform_indices = @transform_0, window_bounds = array<i64: 1, 1, 8, 16>}, {transform_indices = @transform_1, window_bounds = array<i64: 1, 1, 8, 16>}, {transform_indices = @transform_2, window_bounds = array<i64: 1, 8, 16>}]} {
    %c0 = arith.constant 0 : index
    %c0_0 = arith.constant 0 : index
    %c0_1 = arith.constant 0 : index
    %c0_2 = arith.constant 0 : index
    %0 = vector.load %arg3[%c0, %c0_0, %c0_1, %c0_2] : memref<1x1x8x16xf32, #tpu.memory_space<vmem>>, vector<1x1x8x16xf32>
    %1 = vector.shape_cast %0 : vector<1x1x8x16xf32> to vector<1x8x16xf32>
    %cst = arith.constant dense<0xFF800000> : vector<1x16xf32>
    %2 = vector.multi_reduction <maximumf>, %1, %cst [1] : vector<1x8x16xf32> to vector<1x16xf32>
    %3 = vector.shape_cast %2 : vector<1x16xf32> to vector<1x1x16xf32>
    %4 = vector.broadcast %3 : vector<1x1x16xf32> to vector<1x8x16xf32>
    %5 = arith.subf %1, %4 : vector<1x8x16xf32>
    %6 = math.exp %5 : vector<1x8x16xf32>
    %cst_3 = arith.constant dense<0.000000e+00> : vector<1x16xf32>
    %7 = vector.multi_reduction <add>, %6, %cst_3 [1] : vector<1x8x16xf32> to vector<1x16xf32>
    %8 = vector.shape_cast %7 : vector<1x16xf32> to vector<1x1x16xf32>
    %9 = vector.broadcast %8 : vector<1x1x16xf32> to vector<1x8x16xf32>
    %10 = arith.divf %6, %9 : vector<1x8x16xf32>
    %c0_4 = arith.constant 0 : index
    %c0_5 = arith.constant 0 : index
    %c0_6 = arith.constant 0 : index
    %c0_7 = arith.constant 0 : index
    %11 = vector.load %arg2[%c0_4, %c0_5, %c0_6, %c0_7] : memref<1x1x8x16xf32, #tpu.memory_space<vmem>>, vector<1x1x8x16xf32>
    %12 = vector.shape_cast %11 : vector<1x1x8x16xf32> to vector<1x8x16xf32>
    %13 = arith.mulf %12, %10 : vector<1x8x16xf32>
    %c0_8 = arith.constant 0 : index
    %c0_9 = arith.constant 0 : index
    %c0_10 = arith.constant 0 : index
    %14 = vector.load %arg4[%c0_8, %c0_9, %c0_10] : memref<1x8x16xf32, #tpu.memory_space<vmem>>, vector<1x8x16xf32>
    tpu.vector_store %arg4[%c0_8, %c0_9, %c0_10], %13 {strides = array<i32>} : memref<1x8x16xf32, #tpu.memory_space<vmem>>, vector<1x8x16xf32>,
    return
  }
  func.func @transform_0(%arg0: i32, %arg1: i32) -> (i32, i32, i32, i32) {
    %c0_i32 = arith.constant 0 : i32
    %c0_i32_0 = arith.constant 0 : i32
    %c0_i32_1 = arith.constant 0 : i32
    return %arg0, %c0_i32, %c0_i32_0, %arg1 : i32, i32, i32, i32
  }
  func.func @transform_1(%arg0: i32, %arg1: i32) -> (i32, i32, i32, i32) {
    %c1_i32 = arith.constant 1 : i32
    %c0_i32 = arith.constant 0 : i32
    %c0_i32_0 = arith.constant 0 : i32
    return %arg0, %c1_i32, %c0_i32, %arg1 : i32, i32, i32, i32
  }
  func.func @transform_2(%arg0: i32, %arg1: i32) -> (i32, i32, i32) {
    %c0_i32 = arith.constant 0 : i32
    %c0_i32_0 = arith.constant 0 : i32
    return %arg0, %c0_i32, %arg1 : i32, i32, i32
  }
}

</mosaic_0001>

<bundles_post_ra>
// kernel: tpu_custom_call.1
= control target key start
LH: loop header
LB: loop body
LE: loop exit
PB: predicated region body
PF: predicated region fallthrough
CT: control target
= control target key end

     0   :  { %7 = vsyncpa [#allocation3], 0  ;;  %s784_s0 = inlined_call_operand.hbm [shape: f32[2,2,8,16], index: 0, kind: input, shape index: {}]   ;;  %s785_s1 = inlined_call_operand.hbm [shape: f32[2,2,8,16], index: 1, kind: input, shape index: {}]   ;;  %s786_s2 = inlined_call_operand.hbm [shape: f32[2,8,16], index: 2, kind: output, shape index: {}]  }
   0x1   :  { %9 = vsyncpa [#allocation3 + $0x1], 0 }
   0x2   :  { %10 = vsyncpa [#allocation6], 0 }
   0x3   :  { %12 = vsyncpa [#allocation6 + $0x1], 0 }
   0x4   :  { %13 = vsyncpa [#allocation4], 0 }
   0x5   :  { %15 = vsyncpa [#allocation4 + $0x1], 0  ;;  %s638_s9 = smov 0   ;;  %s640_s10 = smov 0  }
   0x6   :  { %s642_s11 = smov 0   ;;  %s644_s12 = smov 0  }
   0x7   :  { %s646_s13 = smov 0   ;;  %s648_s14 = smov 0  }
   0x8 LB: > { %s384_s15 = sadd.s32 4294967295, %s621_s14   ;;  %s385_s16 = sadd.s32 4294967294, %s621_s14   ;;  %s621_s14 = sphi %s648_s14, %s21_s14   ;;  %s617_s13 = sphi %s646_s13, %s796_s13   ;;  %s613_s12 = sphi %s644_s12, %s795_s12   ;;  %s609_s11 = sphi %s642_s11, %s794_s11   ;;  %s605_s10 = sphi %s640_s10, %s793_s10   ;;  %s601_s9 = sphi %s638_s9, %s792_s9  }
   0x9   : > { %s33_s17 = sadd.s32 1, %s617_s13  ;;  %s42_s18 = sadd.s32 1, %s609_s11 }
   0xa   : > { %p35_p0 = scmp.ge.s32.totalorder %s33_s17, 2  ;;  %p49_p1 = scmp.ne.s32.totalorder %s609_s11, %s605_s10 }
   0xb   : > { %p50_p2 = scmp.eq.s32.totalorder %s621_s14, 0  ;;  %p55_p3 = scmp.ne.s32.totalorder %s605_s10, %s601_s9 }
   0xc   : > { %s798_s17 = smov (%p35_p0, %s33_s17), 0  ;;  %p56_p5 = scmp.eq.s32.totalorder %s384_s15, 0 }
   0xd   : > { %p679_p4 = por %p50_p2, %p49_p1  ;;  %s37_s20 = ssub.s32 %s617_s13, %s798_s17 }
   0xe   : > { %p109_p6 = scmp.eq.s32.totalorder %s384_s15, 1  ;;  %p40_p7 = scmp.eq.s32.totalorder %s37_s20, 0 }
   0xf   : > { %p685_p8 = por %p56_p5, %p55_p3  ;;  %p115_p10 = scmp.eq.s32.totalorder %s385_s16, 1 }
  0x10   : > { %p689_p9 = por %p109_p6, %p49_p1  ;;  %p387_p12 = scmp.ge.s32.totalorder %s621_s14, 2 }
  0x11   : > { %s694_s23 = scalar_select %p40_p7, %s609_s11, %s42_s18  }
  0x12   : > { %p696_p11 = por %p115_p10, %p55_p3  ;;  %p421_p13 = scmp.lt.s32.totalorder %s621_s14, 2 }
  0x13   : > { %s135_s25 = sand.u32 1, %s609_s11   ;;  %s402_s27 = sshll.u32 %s617_s13, 4 }
  0x14   : > { %s388_s26 = sshll.u32 %s135_s25, 3  ;;  %s145_s30 = scalar_lea.hbm %s784_s0, %s402_s27 }
  0x15   : > { %s139_s3 = scalar_lea.vmem [#allocation2], %s388_s26  ;;  %s147_s5 = sshll.u32 %s145_s30, 4  ;;  %s148_s5 = int_to_ptr.hbm [resolvable:$true] %s147_s5 }
  0x16   : > { %s149_s4 = sshll.u32 %s139_s3, 4  ;;  %p709_p0 = pnand %p421_p13, %p679_p4  ;;  %s150_s4 = int_to_ptr.vmem [resolvable:$true] %s149_s4 }
  0x17   : > { %p394_p1 = scmp.ge.s32.totalorder %s621_s14, 1  ;;  %p176_p2 = scmp.lt.s32.totalorder %s621_s14, 3 }
  0x18   : > { %s136_s7 = scalar_lea.sflag [#allocation3], %s135_s25  ;;  %s317_s16 = scalar_lea.hbm %s785_s1, %s402_s27 }
  0x19   : > { %413 = dma.hbm_to_vmem [thread:$0]  (!%p709_p0), %s148_s5, 128, %s150_s4, %s136_s7  }
  0x1a   : > { %p177_p3 = pnand %p394_p1, %p176_p2  ;;  %s160_s18 = scalar_lea.vmem [#allocation5], %s388_s26 }
  0x1b   : > { %s171_s20 = sshll.u32 %s160_s18, 4  ;;  %s318_s28 = scalar_lea.hbm %s317_s16, 8  ;;  %s172_s20 = int_to_ptr.vmem [resolvable:$true] %s171_s20 }
  0x1c   : > { %s169_s19 = sshll.u32 %s318_s28, 4  ;;  %s157_s29 = scalar_lea.sflag [#allocation6], %s135_s25  ;;  %s170_s19 = int_to_ptr.hbm [resolvable:$true] %s169_s19 }
  0x1d   : > { %416 = dma.hbm_to_vmem [thread:$0]  (!%p709_p0), %s170_s19, 128, %s172_s20, %s157_s29  }
  0x1e   : > { %180 = sbr.rel (%p177_p3) target bundleno = 100 (0x64), region = 28  ;;  %s723_s30 = sand.u32 (!%p177_p3), 1, %s605_s10  }
  0x1f   : > { %s726_s3 = sshll.u32 (!%p177_p3), %s723_s30, 3  ;;  %s183_s27 = scalar_lea.sflag (!%p177_p3), [#allocation3], %s723_s30 }
  0x20   : > { %s186_s26 = scalar_lea.vmem (!%p177_p3), [#allocation2], %s726_s3 }
  0x23   : > { %588 = dma.done.wait (%p685_p8), %s183_s27, 128  }
  0x24   : > { %590 = vsyncadd (%p685_p8), %s183_s27, 4294967168  ;;  %s193_s25 = scalar_lea.sflag [#allocation6], %s723_s30  ;;  %s196_s4 = scalar_lea.vmem [#allocation5], %s726_s3 }
  0x25   : > { %592 = dma.done.wait (%p685_p8), %s193_s25, 128  }
  0x26   : > { %594 = vsyncadd (%p685_p8), %s193_s25, 4294967168  ;;  %vm224_vm0 = vcmask 130048   ;;  %v223_v0 = vld [vmem:[%s196_s4] sm:$0xff]  ;;  %s399_s21 = sshll.u32 %s613_s12, 3  ;;  %v257_v28 = vld [vmem:[%s186_s26] sm:$0xff]  ;;  %s222_s8 = scalar_lea.vmem [#allocation7], %s726_s3 }
  0x27   : > { %v225_v1 = vsel %vm224_vm0, %v223_v0, -inf  ;;  %s272_s7 = scalar_lea.hbm %s786_s2, %s399_s21  ;;  %s274_s15 = sshll.u32 %s222_s8, 4  ;;  %s275_s15 = int_to_ptr.vmem [resolvable:$true] %s274_s15 }
  0x28   : > { %v226_v2 = vrot.slane %v225_v1, 4  ;;  %s276_s16 = sshll.u32 %s272_s7, 4  ;;  %s261_s12 = scalar_lea.sflag [#allocation4], %s723_s30  ;;  %s277_s16 = int_to_ptr.hbm [resolvable:$true] %s276_s16 }
  0x29   : > { %s549_s18 = sshra.s32 %s277_s16, 4  ;;  %s555_s29 = scalar_lea.hbm %s786_s2, 16  ;;  %s550_s18 = int_to_ptr.hbm [resolvable:$true] %s549_s18 }
  0x2a   : > { %v227_v3 = vmax.f32 %v225_v1, %v226_v2  ;;  %s551_s20 = scalar_lea.hbm %s550_s18, 8  ;;  %p556_p7 = scmp.lt.s32.totalorder %s550_s18, %s786_s2 }
  0x2b   : > { %p552_p4 = scmp.ne.s32.totalorder %s550_s18, %s551_s20  ;;  %p557_p8 = scmp.lt.s32.totalorder %s555_s29, %s551_s20 }
  0x2c   : > { %v228_v4 = vrot.slane %v227_v3, 2 }
  0x2d   : > { %p553_p5 = pnand %p552_p4, %p689_p9  ;;  %p558_p10 = por %p557_p8, %p556_p7 }
  0x2e   : > { %v229_v5 = vmax.f32 %v227_v3, %v228_v4 }
  0x2f   : > { %p554_p6 = pneg %p553_p5 }
  0x30   : > { %v230_v6 = vrot.slane %v229_v5, 1 }
  0x31   : > { %p559_p13 = pnand %p558_p10, %p554_p6 }
  0x32   : > { %v231_v7 = vmax.f32 %v229_v5, %v230_v6 }
  0x34   : > { %v232_v8 = vsub.f32 %v223_v0, %v231_v7 }
  0x36   : > { %v233_v9 = vmul.f32 1.442695, %v232_v8 }
  0x38   : > { %471 = vpow2.f32 %v233_v9 }
  0x3e   : > { %v472_v10 = vpop.eup %471 }
  0x3f   : > { %v235_v11 = vsel %vm224_vm0, %v472_v10, 0.0 }
  0x40   : > { %v236_v12 = vrot.slane %v235_v11, 4 }
  0x42   : > { %v237_v13 = vadd.f32 %v236_v12, %v235_v11 }
  0x44   : > { %v238_v14 = vrot.slane %v237_v13, 2 }
  0x46   : > { %v239_v15 = vadd.f32 %v238_v14, %v237_v13 }
  0x48   : > { %v240_v16 = vrot.slane %v239_v15, 1 }
  0x4a   : > { %v241_v17 = vadd.f32 %v240_v16, %v239_v15 }
  0x4c   : > { %473 = vrcp.f32 %v241_v17  ;;  %v253_v20 = vand.u32 2147483648, %v241_v17  ;;  %vm247_vm1 = vweird.f32 %v241_v17  ;;  %v251_v22 = vand.u32 2147483647, %v241_v17 }
  0x4e   : > { %v254_v24 = vor.u32 1.1754944e-38, %v253_v20  ;;  %vm252_vm4 = vcmp.eq.f32.partialorder %v251_v22, 8.507059e+37 }
  0x52   : > { %v474_v18 = vpop.eup %473 }
  0x53   : > { %v243_v19 = vmul.f32 %v474_v18, %v241_v17  ;;  %vm248_vm2 = vweird.f32 %v474_v18 }
  0x54   : > { %vm249_vm3 = vmor %vm247_vm1, %vm248_vm2 }
  0x55   : > { %v244_v21 = vsub.f32 1.0, %v243_v19 }
  0x57   : > { %v245_v23 = vmul.f32 %v474_v18, %v244_v21 }
  0x59   : > { %v246_v25 = vadd.f32 %v474_v18, %v245_v23 }
  0x5b   : > { %v250_v26 = vsel %vm249_vm3, %v474_v18, %v246_v25 }
  0x5c   : > { %v255_v27 = vsel %vm252_vm4, %v254_v24, %v250_v26 }
  0x5d   : > { %v256_v29 = vmul.f32 %v472_v10, %v255_v27 }
  0x5f   : > { %v258_v30 = vmul.f32 %v257_v28, %v256_v29 }
  0x61   : > { %259 = vst.msk [vmem:[%s222_s8] sm:$0xff] %vm224_vm0, %v258_v30 }
  0x62   : > { %562 = shalt.err (!%p559_p13)
}
  0x63   : > { %408 = dma.vmem_to_hbm [thread:$0]  (%p689_p9), %s275_s15, 128, %s277_s16, %s261_s12  }
  0x64 PF: > { %s288_s30 = sand.u32 1, %s601_s9   ;;  %p418_p0 = pnand %p387_p12, %p696_p11 }
  0x65   : > { %s289_s26 = scalar_lea.sflag [#allocation4], %s288_s30 }
  0x66   : > { %p419_p1 = pneg %p418_p0 }
  0x68   : > { %596 = dma.done.wait (%p419_p1), %s289_s26, 128  }
  0x69   : > { %598 = vsyncadd (%p419_p1), %s289_s26, 4294967168  ;;  %s21_s14 = sadd.s32 1, %s621_s14   ;;  %s792_s9 = smov %s605_s10 }
  0x6a   : > { %p18_p2 = scmp.ge.s32.totalorder %s21_s14, 4   ;;  %s793_s10 = smov %s609_s11 }
  0x6b   : > { %s794_s11 = smov %s694_s23  ;;  %s795_s12 = smov %s617_s13 }
  0x6c   : > { %s796_s13 = smov %s798_s17  ;;  %20 = sbr.rel (!%p18_p2) target bundleno = 8 (0x8), region = 86 }
  0x71   :  { %295 = vsyncpa [#allocation3], 1 }
  0x72   :  { %297 = vsyncpa [#allocation3 + $0x1], 1 }
  0x73   :  { %298 = vsyncpa [#allocation6], 1 }
  0x74   :  { %300 = vsyncpa [#allocation6 + $0x1], 1 }
  0x75   :  { %301 = vsyncpa [#allocation4], 1 }
  0x76   :  { %303 = vsyncpa [#allocation4 + $0x1], 1 }

</bundles_post_ra>
